<compile_context>
chip_gen: v5e
topology: v5e:2x2
jax: 0.10.0
libtpu: 0.0.40
codegen_flags: <defaults>
</compile_context>

<pallas_src>
import math
from functools import partial

import jax
import jax.numpy as jnp
from jax import lax
from jax.experimental import pallas as pl
from jax.experimental.pallas import tpu as pltpu

BN_EPS = 1e-5        # PyTorch BatchNorm2d default
LN_EPS = 1e-5        # PyTorch LayerNorm default
LEAKY_SLOPE = 0.1
MXU_DTYPE = jnp.bfloat16   # matmul-operand dtype (f32 accumulate); jnp.float32 for exactness


# ---------------------------------------------------------------------------
# token <-> image helpers (mirror img2token / token2img from the PyTorch code)
# ---------------------------------------------------------------------------
def img2token(x_nchw):
    n, c, h, w = x_nchw.shape
    return jnp.transpose(x_nchw.reshape(n, c, h * w), (0, 2, 1))          # (N, H*W, C)


def token2img(x_btc):
    b, t, c = x_btc.shape
    img_sz = int(math.sqrt(t))
    x = x_btc[:, : img_sz * img_sz, :]
    return jnp.transpose(x.reshape(b, img_sz, img_sz, c), (0, 3, 1, 2))   # NCHW


# ---------------------------------------------------------------------------
# VMEM budgeting / tile selection
# ---------------------------------------------------------------------------
def _tpu_vmem_capacity():
    try:
        cap = getattr(pltpu.get_tpu_info(), "vmem_capacity_bytes", None)
        if cap:
            return int(cap)
    except Exception:
        pass
    return 64 << 20          # conservative fallback (v7x per-TC VMEM)


def _vmem_budget_bytes():
    # Per-step double-buffered block budget; leaves headroom for weights, semaphores
    # and compiler-internal scratch.
    return int(_tpu_vmem_capacity() * 0.45)


def _vmem_limit_bytes():
    return int(_tpu_vmem_capacity() * 0.85)


def _pick_tile(total, unit, per_elem_bytes, batch, min_steps=4):
    """Pick a tile size along `total` that (a) is a multiple of `unit` and divides
    `total` (else fall back to the full extent), (b) fits the per-step VMEM budget
    (double-buffered), and (c) yields at least `min_steps` total grid steps when
    possible (pipelining + v7x megacore sharding)."""
    if total <= 0 or total < unit or total % unit != 0:
        return total
    budget = _vmem_budget_bytes()
    n_units = total // unit
    cap_units = max(budget // max(per_elem_bytes * unit, 1), 1)
    divs = sorted((d for d in range(1, n_units + 1) if n_units % d == 0), reverse=True)
    fitting = [d for d in divs if d <= cap_units] or [divs[-1]]
    for target in (min_steps, 2, 1):
        for d in fitting:                       # descending -> largest tile first
            if batch * (n_units // d) >= target:
                return d * unit
    return unit


# ---------------------------------------------------------------------------
# Pallas kernels
# ---------------------------------------------------------------------------
def _conv_adapter_kernel(x_ref, w_ref, b_ref, o_ref, *, nonlinearity,
                         in_tokens, out_tokens):
    # NCHW-in : x (Cin, hw_tile), w (Cout, Cin), bias (Cout, 1) -> y (Cout, hw_tile)
    # token-in: x (hw_tile, Cin), w (Cin, Cout), bias (1, Cout) -> y (hw_tile, Cout)
    # All BN / conv-chain folding is done in the wrapper; one MXU matmul per block.
    x = x_ref[0].astype(w_ref.dtype)            # in-register cast (hides under MXU)
    if in_tokens:
        y = jnp.dot(x, w_ref[...], preferred_element_type=jnp.float32)
    else:
        y = jnp.dot(w_ref[...], x, preferred_element_type=jnp.float32)
    y = y + b_ref[...]                          # folded BN bias (f32)
    if nonlinearity:
        y = jnp.where(y > 0, y, LEAKY_SLOPE * y)    # LeakyReLU(0.1)
    if out_tokens != in_tokens:
        y = y.T                                 # fused img2token / token2img (XLU)
    o_ref[0] = y.astype(o_ref.dtype)


def _fc_adapter_kernel(x_ref, w_ref, gl_ref, bl_ref, gt_ref, bt_ref, o_ref, *,
                       leading_norm, trailing_norm, nonlinearity):
    # x_ref: (1, t_tile, Cin) tokens (native dtype); w_ref: (Cin, Cout) folded chain.
    x = x_ref[0].astype(jnp.float32)            # LN math in f32 (v5e-safe)
    if leading_norm:
        mu = jnp.mean(x, axis=-1, keepdims=True)
        ex2 = jnp.mean(x * x, axis=-1, keepdims=True)
        var = jnp.maximum(ex2 - mu * mu, 0.0)   # one-pass LN statistics
        x = (x - mu) * lax.rsqrt(var + LN_EPS) * gl_ref[...] + bl_ref[...]
    y = jnp.dot(x.astype(w_ref.dtype), w_ref[...],
                preferred_element_type=jnp.float32)            # (t_tile, Cout) f32
    if trailing_norm:
        mu = jnp.mean(y, axis=-1, keepdims=True)
        ex2 = jnp.mean(y * y, axis=-1, keepdims=True)
        var = jnp.maximum(ex2 - mu * mu, 0.0)
        y = (y - mu) * lax.rsqrt(var + LN_EPS) * gt_ref[...] + bt_ref[...]
    if nonlinearity:
        y = jnp.where(y > 0, y, LEAKY_SLOPE * y)
    o_ref[0] = y.astype(o_ref.dtype)


# ---------------------------------------------------------------------------
# Wrappers
# ---------------------------------------------------------------------------
def _fold_bn(gamma, beta, mean, var):
    scale = gamma / jnp.sqrt(var + BN_EPS)
    return scale, beta - mean * scale


def conv_adapter_forward(x, params, cfg, *, in_tokens=False, out_tokens=False):
    """Conv-path adapter. in_tokens fuses token2img (vit2cnn), out_tokens fuses
    img2token (cnn2vit) into the kernel. Returns (y, (H, W))."""
    assert cfg.get('stride', 1) == 1, 'only stride=1 conv adapters are supported'

    if in_tokens:
        assert x.ndim == 3
        n, t, cin = x.shape
        img_sz = int(math.sqrt(t))
        h = w_sp = img_sz
        hw = img_sz * img_sz
        x2 = x[:, :hw, :]                         # token_limit slice (no-op if t == hw)
    else:
        assert x.ndim == 4
        n, cin, h, w_sp = x.shape
        hw = h * w_sp
        x2 = x.reshape(n, cin, hw)                # free reshape, contiguous

    # Fold the 1x1-conv chain (no nonlinearity between convs) into one matrix.
    wc = params['conv_ws'][0][:, :, 0, 0].astype(jnp.float32)              # (C1, Cin)
    for wk in params['conv_ws'][1:]:
        wc = wk[:, :, 0, 0].astype(jnp.float32) @ wc
    cout = wc.shape[0]

    # Fold leading / trailing BatchNorm (inference form) -> single W_eff (f32) + bias.
    if cfg.get('leading_norm', True):
        s1, b1 = _fold_bn(*params['bn_lead'])
    else:
        s1 = jnp.ones((cin,), jnp.float32)
        b1 = jnp.zeros((cin,), jnp.float32)
    if cfg.get('trailing_norm', False):
        s2, b2 = _fold_bn(*params['bn_trail'])
    else:
        s2 = jnp.ones((cout,), jnp.float32)
        b2 = jnp.zeros((cout,), jnp.float32)
    w_eff = (s2[:, None] * wc) * s1[None, :]                               # (Cout, Cin)
    bias = s2 * (wc @ b1) + b2                                             # (Cout,)

    out_dtype = jnp.dtype(cfg.get('out_dtype', x.dtype))
    in_bytes = jnp.dtype(x.dtype).itemsize
    out_bytes = out_dtype.itemsize

    hw_tile = _pick_tile(hw, 128, 2 * (cin * in_bytes + cout * out_bytes), n)
    grid = (n, hw // hw_tile)

    if in_tokens:
        x_spec = pl.BlockSpec((1, hw_tile, cin), lambda i, j: (i, j, 0))
        w_arr, w_spec = w_eff.T, pl.BlockSpec((cin, cout), lambda i, j: (0, 0))
        b_arr, b_spec = bias.reshape(1, cout), pl.BlockSpec((1, cout), lambda i, j: (0, 0))
    else:
        x_spec = pl.BlockSpec((1, cin, hw_tile), lambda i, j: (i, 0, j))
        w_arr, w_spec = w_eff, pl.BlockSpec((cout, cin), lambda i, j: (0, 0))
        b_arr, b_spec = bias.reshape(cout, 1), pl.BlockSpec((cout, 1), lambda i, j: (0, 0))

    if out_tokens:
        out_shape = jax.ShapeDtypeStruct((n, hw, cout), out_dtype)
        out_spec = pl.BlockSpec((1, hw_tile, cout), lambda i, j: (i, j, 0))
    else:
        out_shape = jax.ShapeDtypeStruct((n, cout, hw), out_dtype)
        out_spec = pl.BlockSpec((1, cout, hw_tile), lambda i, j: (i, 0, j))

    out = pl.pallas_call(
        partial(_conv_adapter_kernel, nonlinearity=cfg.get('nonlinearity', True),
                in_tokens=in_tokens, out_tokens=out_tokens),
        out_shape=out_shape,
        grid=grid,
        in_specs=[x_spec, w_spec, b_spec],
        out_specs=out_spec,
        compiler_params=pltpu.CompilerParams(
            dimension_semantics=("parallel", "parallel"),
            vmem_limit_bytes=_vmem_limit_bytes()),
    )(x2, w_arr.astype(MXU_DTYPE), b_arr.astype(jnp.float32))

    if out_tokens:
        return out, (h, w_sp)                              # already token layout
    return out.reshape(n, cout, h, w_sp), (h, w_sp)


def fc_adapter_forward(x_btc, params, cfg):
    assert x_btc.ndim == 3
    b, t, cin = x_btc.shape

    wc = params['fc_ws'][0].astype(jnp.float32)                            # (C1, Cin)
    for wk in params['fc_ws'][1:]:
        wc = wk.astype(jnp.float32) @ wc
    cout = wc.shape[0]
    w_t = wc.T                                                             # y = x @ W.T

    leading = bool(cfg.get('leading_norm', True))
    trailing = bool(cfg.get('trailing_norm', False))
    gl, bl = (params['ln_lead'] if leading
              else (jnp.ones((cin,), jnp.float32), jnp.zeros((cin,), jnp.float32)))
    gt, bt = (params['ln_trail'] if trailing
              else (jnp.ones((cout,), jnp.float32), jnp.zeros((cout,), jnp.float32)))

    out_dtype = jnp.dtype(cfg.get('out_dtype', x_btc.dtype))
    in_bytes = jnp.dtype(x_btc.dtype).itemsize
    out_bytes = out_dtype.itemsize

    # Tile over tokens: LayerNorm is per-token, so this is exact.
    t_tile = _pick_tile(t, 8, 2 * (cin * in_bytes + cout * out_bytes), b)
    grid = (b, max(t // t_tile, 1))

    out = pl.pallas_call(
        partial(_fc_adapter_kernel, leading_norm=leading, trailing_norm=trailing,
                nonlinearity=cfg.get('nonlinearity', True)),
        out_shape=jax.ShapeDtypeStruct((b, t, cout), out_dtype),
        grid=grid,
        in_specs=[
            pl.BlockSpec((1, t_tile, cin), lambda i, j: (i, j, 0)),
            pl.BlockSpec((cin, cout), lambda i, j: (0, 0)),
            pl.BlockSpec((1, cin), lambda i, j: (0, 0)),
            pl.BlockSpec((1, cin), lambda i, j: (0, 0)),
            pl.BlockSpec((1, cout), lambda i, j: (0, 0)),
            pl.BlockSpec((1, cout), lambda i, j: (0, 0)),
        ],
        out_specs=pl.BlockSpec((1, t_tile, cout), lambda i, j: (i, j, 0)),
        compiler_params=pltpu.CompilerParams(
            dimension_semantics=("parallel", "parallel"),
            vmem_limit_bytes=_vmem_limit_bytes()),
    )(x_btc, w_t.astype(MXU_DTYPE),
      gl.reshape(1, cin).astype(jnp.float32), bl.reshape(1, cin).astype(jnp.float32),
      gt.reshape(1, cout).astype(jnp.float32), bt.reshape(1, cout).astype(jnp.float32))
    return out


def dery_adapter_forward(x, params, cfg, input_shape=None):
    """Pallas implementation of DeRyAdapter.forward. Returns (output, shape_info)."""
    mode = cfg['mode']
    if cfg.get('num_conv', 0) > 0:
        # Layout transposes are fused into the conv kernel.
        y, hw_shape = conv_adapter_forward(
            x, params, cfg,
            in_tokens=(mode == 'vit2cnn'),    # fused token2img
            out_tokens=(mode == 'cnn2vit'))   # fused img2token
        if mode in ('cnn2vit', 'cnn2cnn', 'vit2cnn'):
            return y, hw_shape
        return y, input_shape
    # fc path (token input expected)
    if mode == 'vit2cnn':
        x = token2img(x)   # TODO(synk): fc adapter on NCHW images is an ill-posed combo
    y = fc_adapter_forward(x, params, cfg)
    if mode == 'cnn2vit':
        imshape = (y.shape[2], y.shape[3])
        return img2token(y), imshape
    if mode in ('cnn2cnn', 'vit2cnn'):
        return y, (y.shape[2], y.shape[3])
    return y, input_shape


# ---------------------------------------------------------------------------
# Pure-JAX reference (mirrors the PyTorch forward, f32, inference-form BN)
# ---------------------------------------------------------------------------
def _bn2d_ref(x, gamma, beta, mean, var):
    inv = gamma / jnp.sqrt(var + BN_EPS)
    return (x - mean[None, :, None, None]) * inv[None, :, None, None] \
        + beta[None, :, None, None]


def _ln_ref(x, gamma, beta):
    mu = jnp.mean(x, axis=-1, keepdims=True)
    var = jnp.mean((x - mu) ** 2, axis=-1, keepdims=True)
    return (x - mu) * lax.rsqrt(var + LN_EPS) * gamma + beta


def _leaky_ref(x):
    return jnp.where(x > 0, x, LEAKY_SLOPE * x)


def reference_forward(x, params, cfg, input_shape=None):
    mode = cfg['mode']
    if mode == 'vit2cnn':
        x = token2img(x)
    y = x
    if cfg.get('num_conv', 0) > 0:
        if cfg.get('leading_norm', True):
            y = _bn2d_ref(y, *params['bn_lead'])
        for k, wk in enumerate(params['conv_ws']):
            s = cfg.get('stride', 1) if k == 0 else 1
            y = lax.conv_general_dilated(y, wk, (s, s), 'VALID',
                                         dimension_numbers=('NCHW', 'OIHW', 'NCHW'))
        if cfg.get('trailing_norm', False):
            y = _bn2d_ref(y, *params['bn_trail'])
        if cfg.get('nonlinearity', True):
            y = _leaky_ref(y)
    else:
        if cfg.get('leading_norm', True):
            y = _ln_ref(y, *params['ln_lead'])
        for wk in params['fc_ws']:
            y = y @ wk.T
        if cfg.get('trailing_norm', False):
            y = _ln_ref(y, *params['ln_trail'])
        if cfg.get('nonlinearity', True):
            y = _leaky_ref(y)
    if mode == 'cnn2vit':
        imshape = (y.shape[2], y.shape[3])
        return img2token(y), imshape
    if mode in ('cnn2cnn', 'vit2cnn'):
        return y, (y.shape[2], y.shape[3])
    return y, input_shape


def _check(name, out, ref):
    err = float(jnp.max(jnp.abs(out.astype(jnp.float32) - ref)))
    scale = float(jnp.max(jnp.abs(ref)))
    # tolerance covers the deliberate bf16 MXU-operand quantization (f32 accumulate)
    assert err <= 3e-2 * (scale + 1.0), (name, err, scale)


# ---------------------------------------------------------------------------
# Demo
# ---------------------------------------------------------------------------
if __name__ == "__main__":
    key = jax.random.PRNGKey(0)
    k = jax.random.split(key, 12)

    # ---- demo 1: cnn2cnn conv adapter: BN(4) -> Conv1x1(4->8) -> LeakyReLU(0.1) ----
    N, Cin, H, W = 2, 4, 16, 16
    Cout = 8
    x_cnn = jax.random.normal(k[0], (N, Cin, H, W), jnp.float32)
    conv_params = {
        'bn_lead': (jax.random.uniform(k[1], (Cin,), jnp.float32, 0.8, 1.2),
                    0.1 * jax.random.normal(k[2], (Cin,), jnp.float32),
                    0.1 * jax.random.normal(k[3], (Cin,), jnp.float32),
                    jax.random.uniform(k[4], (Cin,), jnp.float32, 0.8, 1.2)),
        'conv_ws': [jax.random.normal(k[5], (Cout, Cin, 1, 1), jnp.float32)
                    * (1.0 / Cin) ** 0.5],
    }
    conv_cfg = dict(mode='cnn2cnn', num_conv=1, num_fc=0, stride=1,
                    leading_norm=True, trailing_norm=False, nonlinearity=True)

    out_cnn, hw_shape = dery_adapter_forward(x_cnn, conv_params, conv_cfg)
    out_cnn = jax.block_until_ready(out_cnn)
    ref_cnn, ref_hw = reference_forward(x_cnn, conv_params, conv_cfg)
    assert out_cnn.shape == (N, Cout, H, W), out_cnn.shape
    assert hw_shape == (H, W) and ref_hw == (H, W)
    _check("cnn2cnn", out_cnn, ref_cnn)

    # ---- demo 1b: same adapter in cnn2vit mode (fused img2token output) ----
    c2v_cfg = dict(conv_cfg, mode='cnn2vit')
    out_c2v, imshape = dery_adapter_forward(x_cnn, conv_params, c2v_cfg)
    out_c2v = jax.block_until_ready(out_c2v)
    ref_c2v, ref_imshape = reference_forward(x_cnn, conv_params, c2v_cfg)
    assert out_c2v.shape == (N, H * W, Cout) and imshape == (H, W) == ref_imshape
    _check("cnn2vit", out_c2v, ref_c2v)

    # ---- demo 1c: same adapter in vit2cnn mode (fused token2img input) ----
    v2c_cfg = dict(conv_cfg, mode='vit2cnn')
    x_tok = img2token(x_cnn)                                  # (N, H*W, Cin)
    out_v2c, v2c_shape = dery_adapter_forward(x_tok, conv_params, v2c_cfg)
    out_v2c = jax.block_until_ready(out_v2c)
    ref_v2c, ref_v2c_shape = reference_forward(x_tok, conv_params, v2c_cfg)
    assert out_v2c.shape == (N, Cout, H, W) and v2c_shape == (H, W) == ref_v2c_shape
    _check("vit2cnn", out_v2c, ref_v2c)

    # ---- demo 2: vit2vit fc adapter: LN(32) -> Linear(32->128) -> LeakyReLU(0.1) ----
    B, T, Din, Dout = 2, 8, 32, 128
    x_vit = jax.random.normal(k[6], (B, T, Din), jnp.float32)
    fc_params = {
        'ln_lead': (jax.random.uniform(k[7], (Din,), jnp.float32, 0.8, 1.2),
                    0.1 * jax.random.normal(k[8], (Din,), jnp.float32)),
        'fc_ws': [jax.random.normal(k[9], (Dout, Din), jnp.float32)
                  * (1.0 / Din) ** 0.5],
    }
    fc_cfg = dict(mode='vit2vit', num_fc=1, num_conv=0,
                  leading_norm=True, trailing_norm=False, nonlinearity=True)

    out_vit, shp = dery_adapter_forward(x_vit, fc_params, fc_cfg, input_shape=(T, 1))
    out_vit = jax.block_until_ready(out_vit)
    ref_vit, _ = reference_forward(x_vit, fc_params, fc_cfg, input_shape=(T, 1))
    assert out_vit.shape == (B, T, Dout), out_vit.shape
    assert shp == (T, 1)
    _check("vit2vit", out_vit, ref_vit)

    print("KERNEL_OK")
</pallas_src>

<mosaic_0001>
module attributes {stable_mosaic.version = 11 : i64} {
  func.func @_conv_adapter_kernel(%arg0: i32, %arg1: i32, %arg2: memref<1x4x128xf32, #tpu.memory_space<vmem>>, %arg3: memref<8x4xbf16, #tpu.memory_space<vmem>>, %arg4: memref<8x1xf32, #tpu.memory_space<vmem>>, %arg5: memref<1x8x128xf32, #tpu.memory_space<vmem>>) attributes {dimension_semantics = [#tpu.dimension_semantics<parallel>, #tpu.dimension_semantics<parallel>], iteration_bounds = array<i64: 2, 2>, scalar_prefetch = 0 : i64, scratch_operands = 0 : i64, tpu.core_type = #tpu.core_type<tc>, window_params = [{transform_indices = @transform_0, window_bounds = array<i64: 1, 4, 128>}, {pipeline_mode = #tpu.pipeline_mode<synchronous>, transform_indices = @transform_1, window_bounds = array<i64: 8, 4>}, {pipeline_mode = #tpu.pipeline_mode<synchronous>, transform_indices = @transform_2, window_bounds = array<i64: 8, 1>}, {transform_indices = @transform_3, window_bounds = array<i64: 1, 8, 128>}]} {
    %c0 = arith.constant 0 : index
    %c0_0 = arith.constant 0 : index
    %c0_1 = arith.constant 0 : index
    %0 = vector.load %arg2[%c0, %c0_0, %c0_1] : memref<1x4x128xf32, #tpu.memory_space<vmem>>, vector<1x4x128xf32>
    %1 = vector.shape_cast %0 : vector<1x4x128xf32> to vector<4x128xf32>
    %2 = arith.truncf %1 : vector<4x128xf32> to vector<4x128xbf16>
    %c0_2 = arith.constant 0 : index
    %c0_3 = arith.constant 0 : index
    %3 = vector.load %arg3[%c0_2, %c0_3] : memref<8x4xbf16, #tpu.memory_space<vmem>>, vector<8x4xbf16>
    %cst = arith.constant dense<0.000000e+00> : vector<8x128xf32>
    %4 = tpu.matmul %3, %2, %cst {dimension_numbers = #tpu.dot_dimension_numbers<[1], [0], [0], [1], [0, 0, 1, 1], [], []>} : vector<8x4xbf16>, vector<4x128xbf16>, vector<8x128xf32> -> vector<8x128xf32>
    %c0_4 = arith.constant 0 : index
    %c0_5 = arith.constant 0 : index
    %5 = vector.load %arg4[%c0_4, %c0_5] : memref<8x1xf32, #tpu.memory_space<vmem>>, vector<8x1xf32>
    %6 = vector.broadcast %5 : vector<8x1xf32> to vector<8x128xf32>
    %7 = arith.addf %4, %6 : vector<8x128xf32>
    %cst_6 = arith.constant 0.000000e+00 : f32
    %8 = vector.broadcast %cst_6 : f32 to vector<8x128xf32>
    %9 = arith.cmpf ogt, %7, %8 : vector<8x128xf32>
    %cst_7 = arith.constant 1.000000e-01 : f32
    %10 = vector.broadcast %cst_7 : f32 to vector<8x128xf32>
    %11 = arith.mulf %10, %7 : vector<8x128xf32>
    %12 = arith.select %9, %7, %11 : vector<8x128xi1>, vector<8x128xf32>
    %c0_8 = arith.constant 0 : index
    %c0_9 = arith.constant 0 : index
    %c0_10 = arith.constant 0 : index
    %13 = vector.load %arg5[%c0_8, %c0_9, %c0_10] : memref<1x8x128xf32, #tpu.memory_space<vmem>>, vector<1x8x128xf32>
    %14 = vector.shape_cast %13 : vector<1x8x128xf32> to vector<8x128xf32>
    %15 = vector.shape_cast %12 : vector<8x128xf32> to vector<1x8x128xf32>
    tpu.vector_store %arg5[%c0_8, %c0_9, %c0_10], %15 {strides = array<i32>} : memref<1x8x128xf32, #tpu.memory_space<vmem>>, vector<1x8x128xf32>,
    return
  }
  func.func @transform_0(%arg0: i32, %arg1: i32) -> (i32, i32, i32) {
    %c0_i32 = arith.constant 0 : i32
    %c0_i32_0 = arith.constant 0 : i32
    return %arg0, %c0_i32, %arg1 : i32, i32, i32
  }
  func.func @transform_1(%arg0: i32, %arg1: i32) -> (i32, i32) {
    %c0_i32 = arith.constant 0 : i32
    %c0_i32_0 = arith.constant 0 : i32
    %c0_i32_1 = arith.constant 0 : i32
    return %c0_i32, %c0_i32_0 : i32, i32
  }
  func.func @transform_2(%arg0: i32, %arg1: i32) -> (i32, i32) {
    %c0_i32 = arith.constant 0 : i32
    %c0_i32_0 = arith.constant 0 : i32
    %c0_i32_1 = arith.constant 0 : i32
    return %c0_i32, %c0_i32_0 : i32, i32
  }
  func.func @transform_3(%arg0: i32, %arg1: i32) -> (i32, i32, i32) {
    %c0_i32 = arith.constant 0 : i32
    %c0_i32_0 = arith.constant 0 : i32
    return %arg0, %c0_i32, %arg1 : i32, i32, i32
  }
}

</mosaic_0001>

<bundles_post_ra>
// kernel: tpu_custom_call.1
= control target key start
LH: loop header
LB: loop body
LE: loop exit
PB: predicated region body
PF: predicated region fallthrough
CT: control target
= control target key end

     0   :  { %8 = vsyncpa [#allocation3], 0  ;;  %s740_s0 = inlined_call_operand.hbm [shape: f32[2,4,256], index: 0, kind: input, shape index: {}]   ;;  %s741_s1 = inlined_call_operand.vmem [shape: bf16[8,4], index: 1, kind: input, shape index: {}]   ;;  %s742_s2 = inlined_call_operand.vmem [shape: f32[8,1], index: 2, kind: input, shape index: {}]   ;;  %s743_s3 = inlined_call_operand.hbm [shape: f32[2,8,256], index: 3, kind: output, shape index: {}]  }
   0x1   :  { %10 = vsyncpa [#allocation3 + $0x1], 0 }
   0x2   :  { %11 = vsyncpa [#allocation4], 0 }
   0x3   :  { %13 = vsyncpa [#allocation4 + $0x1], 0  ;;  %s591_s12 = smov 0   ;;  %s593_s13 = smov 0  }
   0x4   :  { %s595_s14 = smov 0   ;;  %s597_s15 = smov 0  }
   0x5   :  { %s599_s16 = smov 0   ;;  %s601_s17 = smov 0  }
   0x6   :  { %s603_s18 = smov 0   ;;  %s605_s19 = smov 0  }
   0x7 LB: > { %s344_s20 = sadd.s32 4294967295, %s568_s19   ;;  %s345_s21 = sadd.s32 4294967294, %s568_s19   ;;  %s568_s19 = sphi %s605_s19, %s19_s19   ;;  %s564_s18 = sphi %s603_s18, %s757_s18   ;;  %s560_s17 = sphi %s601_s17, %s756_s17   ;;  %s556_s16 = sphi %s599_s16, %s755_s16   ;;  %s552_s15 = sphi %s597_s15, %s754_s15   ;;  %s548_s14 = sphi %s595_s14, %s753_s14   ;;  %s544_s13 = sphi %s593_s13, %s752_s13   ;;  %s540_s12 = sphi %s591_s12, %s751_s12  }
   0x8   : > { %s28_s22 = sadd.s32 1, %s560_s17  ;;  %s31_s23 = sadd.s32 1, %s564_s18 }
   0x9   : > { %p29_p0 = scmp.ge.s32.totalorder %s28_s22, 2  ;;  %s40_s24 = sadd.s32 1, %s548_s14 }
   0xa   : > { %p47_p1 = scmp.ne.s32.totalorder %s548_s14, %s544_s13  ;;  %p48_p2 = scmp.eq.s32.totalorder %s568_s19, 0 }
   0xb   : > { %s759_s22 = smov (%p29_p0, %s28_s22), 0  ;;  %s761_s23 = smov (!%p29_p0, %s31_s23), %s564_s18 }
   0xc   : > { %s36_s25 = ssub.s32 %s560_s17, %s759_s22  ;;  %p644_p3 = por %p48_p2, %p47_p1 }
   0xd   : > { %p33_p4 = scmp.ge.s32.totalorder %s761_s23, 2  ;;  %p53_p5 = scmp.ne.s32.totalorder %s544_s13, %s540_s12 }
   0xe   : > { %p54_p6 = scmp.eq.s32.totalorder %s344_s20, 0  ;;  %p121_p7 = scmp.eq.s32.totalorder %s344_s20, 3 }
   0xf   : > { %s763_s23 = smov (%p33_p4, %s761_s23), 0  ;;  %p127_p10 = scmp.eq.s32.totalorder %s345_s21, 3 }
  0x10   : > { %746 = sst [smem:[#allocation8_spill]] %s763_s23  ;;  %p652_p8 = por %p54_p6, %p53_p5 }
  0x11   : > { %p656_p9 = por %p121_p7, %p47_p1  ;;  %s35_s29 = ssub.s32 %s564_s18, %s763_s23 }
  0x12   : > { %s37_s30 = sor.u32 %s36_s25, %s35_s29  ;;  %p662_p12 = por %p127_p10, %p53_p5 }
  0x13   : > { %p38_p11 = scmp.eq.s32.totalorder %s37_s30, 0  ;;  %p372_p13 = scmp.lt.s32.totalorder %s568_s19, 4 }
  0x14   : > { %s153_s5 = sand.u32 1, %s548_s14   ;;  %s349_s8 = sshll.u32 %s564_s18, 1 }
  0x15   : > { %s669_s6 = scalar_select %p38_p11, %s548_s14, %s40_s24  }
  0x16   : > { %s348_s7 = sshll.u32 %s153_s5, 2  ;;  %s161_s9 = sadd.s32 %s560_s17, %s349_s8 }
  0x17   : > { %s157_s10 = scalar_lea.vmem [#allocation2], %s348_s7  ;;  %s350_s20 = sshll.u32 %s161_s9, 2 }
  0x18   : > { %s167_s11 = sshll.u32 %s157_s10, 4  ;;  %s163_s29 = scalar_lea.hbm %s740_s0, %s350_s20  ;;  %s168_s11 = int_to_ptr.vmem [resolvable:$true] %s167_s11 }
  0x19   : > { %p365_p0 = pnand %p372_p13, %p644_p3  ;;  %s165_s30 = sshll.u32 %s163_s29, 4  ;;  %s166_s30 = int_to_ptr.hbm [resolvable:$true] %s165_s30 }
  0x1a   : > { %p351_p1 = scmp.ge.s32.totalorder %s568_s19, 1  ;;  %s154_s23 = scalar_lea.sflag [#allocation3], %s153_s5 }
  0x1b   : > { %367 = dma.hbm_to_vmem [thread:$0]  (!%p365_p0), %s166_s30, 64, %s168_s11, %s154_s23  }
  0x1c   : > { %p172_p2 = scmp.lt.s32.totalorder %s568_s19, 5 }
  0x1e   : > { %p173_p4 = pnand %p351_p1, %p172_p2 }
  0x1f   : > { %s681_s24 = sand.u32 (!%p173_p4), 1, %s544_s13  }
  0x20   : > { %176 = sbr.rel (%p173_p4) target bundleno = 179 (0xb3), region = 32  ;;  %s352_s7 = sshll.u32 (!%p173_p4), %s681_s24, 2 }
  0x21   : > { %s179_s8 = scalar_lea.sflag (!%p173_p4), [#allocation3], %s681_s24  ;;  %s182_s9 = scalar_lea.vmem (!%p173_p4), [#allocation2], %s352_s7 }
  0x25   : > { %531 = dma.done.wait (%p652_p8), %s179_s8, 64  }
  0x26   : > { %533 = vsyncadd (%p652_p8), %s179_s8, 4294967232  ;;  %v570_v0 = vmov 0   ;;  %v207_v1 = vld [vmem:[%s182_s9] sm:$0xf]  ;;  %vm220_vm0 = vcmask 1041408   ;;  %vm216_vm1 = vcmask 31744  }
  0x27   : > { %439 = vset.pattern.permute.xlu0 %v570_v0  ;;  %v210_v2 = vld [vmem:[%s742_s2] sm:$0xff]  ;;  %v208_v3 = vpack.c.bf16 %v207_v1, %v207_v1  ;;  %s356_s27 = sshll.u32 %s556_s16, 1  ;;  %s353_s20 = sshll.u32 %s681_s24, 3 }
  0x28   : > { %213 = vperm.xlu0 %439, %v210_v2   ;;  %v209_v5 = vld [vmem:[%s741_s1] sm:$0xf]  ;;  %s252_s11 = sadd.s32 %s552_s15, %s356_s27  ;;  %s205_s7 = scalar_lea.vmem [#allocation5], %s353_s20 }
  0x29   : > { %v222_v4 = vsel %vm220_vm0, %v208_v3, 0  ;;  %s357_s21 = sshll.u32 %s252_s11, 3  ;;  %s256_s8 = sshll.u32 %s205_s7, 4  ;;  %s257_s8 = int_to_ptr.vmem [resolvable:$true] %s256_s8 }
  0x2a   : > { %231 = vmatpush.bf16.msra.mxu0 %v222_v4  ;;  %s254_s30 = scalar_lea.hbm %s743_s3, %s357_s21  ;;  %s242_s15 = scalar_lea.sflag [#allocation4], %s681_s24 }
  0x2b   : > { %s258_s9 = sshll.u32 %s254_s30, 4  ;;  %s490_s10 = scalar_lea.hbm %s743_s3, 32  ;;  %s259_s9 = int_to_ptr.hbm [resolvable:$true] %s258_s9 }
  0x2c   : > { %s484_s16 = sshra.s32 %s259_s9, 4  ;;  %s485_s16 = int_to_ptr.hbm [resolvable:$true] %s484_s16 }
  0x2d   : > { %354 = vmatmul.msk.bf16.vlgmr.msra.gmra.mxu0 %vm216_vm1, %v209_v5  ;;  %s486_s23 = scalar_lea.hbm %s485_s16, 8  ;;  %p491_p7 = scmp.lt.s32.totalorder %s485_s16, %s743_s3 }
  0x2e   : > { %p487_p3 = scmp.ne.s32.totalorder %s485_s16, %s486_s23  ;;  %p492_p8 = scmp.lt.s32.totalorder %s490_s10, %s486_s23 }
  0x30   : > { %p488_p5 = pnand %p487_p3, %p656_p9  ;;  %p493_p10 = por %p492_p8, %p491_p7 }
  0x32   : > { %p489_p6 = pneg %p488_p5 }
  0x34   : > { %p494_p11 = pnand %p493_p10, %p489_p6 }
  0x9a   : > { %v214_v6 = vpop.permute.xlu0 %213 }
  0xaa   : > { %v233_v7 = vpop.f32.mrf.mxu0 }
  0xab   : > { %v234_v8 = vadd.f32 %v233_v7, %v214_v6 }
  0xad   : > { %vm237_vm2 = vcmp.gt.f32.partialorder %v234_v8, 0.0  ;;  %v238_v9 = vmul.f32 0.1, %v234_v8 }
  0xaf   : > { %v239_v10 = vsel %vm237_vm2, %v234_v8, %v238_v9 }
  0xb0   : > { %240 = vst [vmem:[%s205_s7] sm:$0xff] %v239_v10 }
  0xb1   : > { %497 = shalt.err (!%p494_p11)
}
  0xb2   : > { %362 = dma.vmem_to_hbm [thread:$0]  (%p656_p9), %s257_s8, 128, %s259_s9, %s242_s15   ;;  %v235_v11 = vpop.f32.mrf.mxu0 }
  0xb3 PF: > { %p373_p13 = scmp.ge.s32.totalorder %s568_s19, 2  ;;  %s270_s24 = sand.u32 1, %s540_s12  }
  0xb4   : > { %s271_s20 = scalar_lea.sflag [#allocation4], %s270_s24 }
  0xb5   : > { %p369_p0 = pnand %p373_p13, %p662_p12 }
  0xb7   : > { %p370_p1 = pneg %p369_p0 }
  0xb9   : > { %535 = dma.done.wait (%p370_p1), %s271_s20, 128  }
  0xba   : > { %537 = vsyncadd (%p370_p1), %s271_s20, 4294967168  ;;  %s19_s19 = sadd.s32 1, %s568_s19   ;;  %s750_s28 = sld [smem:[#allocation8_spill]] }
  0xbb   : > { %p16_p2 = scmp.ge.s32.totalorder %s19_s19, 6   ;;  %s751_s12 = smov %s544_s13 }
  0xbc   : > { %s752_s13 = smov %s548_s14  ;;  %s753_s14 = smov %s669_s6 }
  0xbd   : > { %s754_s15 = smov %s560_s17  ;;  %s755_s16 = smov %s564_s18 }
  0xbe   : > { %s756_s17 = smov %s759_s22  ;;  %18 = sbr.rel (!%p16_p2) target bundleno = 7 (0x7), region = 77 }
  0xc0   : > { %s757_s18 = smov %s750_s28 }
  0xc3   :  { %277 = vsyncpa [#allocation3], 1 }
  0xc4   :  { %279 = vsyncpa [#allocation3 + $0x1], 1 }
  0xc5   :  { %280 = vsyncpa [#allocation4], 1 }
  0xc6   :  { %282 = vsyncpa [#allocation4 + $0x1], 1 }

</bundles_post_ra>
